<compile_context>
chip_gen: v5e
topology: v5e:2x2
jax: 0.10.0
libtpu: 0.0.40
codegen_flags: <defaults>
</compile_context>

<pallas_src>
import jax
import jax.numpy as jnp
from jax.experimental import pallas as pl
from jax.experimental.pallas import tpu as pltpu


_COL_CANDIDATES = (8192, 4096, 2048, 1024, 512, 256, 128)


def _log_compression_kernel(x_ref, o_ref):
    # Upcast to f32 (v5e has no bf16 VPU/EUP path); log1p for accuracy near 0.
    x = x_ref[...].astype(jnp.float32)
    o_ref[...] = jnp.log1p(jnp.abs(x)).astype(o_ref.dtype)


def _vmem_capacity_bytes() -> int:
    try:
        cap = int(getattr(pltpu.get_tpu_info(), "vmem_capacity_bytes", 0))
        if cap > 0:
            return cap
    except Exception:
        pass
    return 64 << 20  # conservative fallback (v7x per-TC VMEM)


def log_compression(x: jnp.ndarray) -> jnp.ndarray:
    """Apply log(|x| + 1) elementwise via a Pallas TPU kernel (any shape)."""
    if not jnp.issubdtype(x.dtype, jnp.floating):
        # Match torch.log's promotion of integer inputs to float.
        x = x.astype(jnp.float32)
    orig_shape = x.shape
    dtype = x.dtype
    total = int(x.size)
    if total == 0:
        return x

    itemsize = jnp.dtype(dtype).itemsize
    sublane = max(8, 32 // max(1, itemsize))  # 8 (f32), 16 (bf16), 32 (int8)

    # Generation-aware block sizing: ~capacity/8 per block, capped at 16 MiB.
    vmem_capacity = _vmem_capacity_bytes()
    target_block_bytes = min(16 << 20, max(1 << 20, vmem_capacity // 8))

    # Lane-dense column count that divides total exactly -> no pad, no slice.
    cols = None
    for c in _COL_CANDIDATES:
        if total % c == 0:
            cols = c
            break

    flat = x.reshape(-1)
    needs_pad = cols is None
    if needs_pad:
        cols = 128
        padded_total = -(-total // cols) * cols  # pad <= 127 elements
        flat = jnp.pad(flat, (0, padded_total - total))
    else:
        padded_total = total
    rows = padded_total // cols
    x2d = flat.reshape(rows, cols)
    full_bytes = rows * cols * itemsize

    # Row tile: sublane-aligned, ~target_block_bytes per block.
    ideal_tile = max(
        sublane,
        (target_block_bytes // (cols * itemsize)) // sublane * sublane,
    )
    if rows > ideal_tile:
        tile_rows = ideal_tile                      # >= 2 grid steps automatically
    elif full_bytes >= (2 << 20) and rows >= 4 * sublane:
        # Medium tensor that would otherwise be one block: split into ~4 blocks
        # so the parallel grid axis can be sharded across v7x's 2 TensorCores.
        tile_rows = max(sublane, (rows // 4) // sublane * sublane)
    else:
        tile_rows = rows                            # single exact full-dims block

    grid = (pl.cdiv(rows, tile_rows),)              # partial last block is masked
    block_bytes = tile_rows * cols * itemsize
    # Double-buffered in + out = 4 x block, plus headroom; stay below physical
    # VMEM (64 MiB v7x, 128 MiB v5e/v6e) with ~8 MiB slack.
    vmem_limit = int(min(max(32 << 20, 6 * block_bytes),
                         max(32 << 20, vmem_capacity - (8 << 20))))

    cost = pl.CostEstimate(
        flops=2 * padded_total,                      # abs + add per element
        transcendentals=padded_total,                # one log per element
        bytes_accessed=2 * padded_total * itemsize,  # read + write
    )

    out2d = pl.pallas_call(
        _log_compression_kernel,
        out_shape=jax.ShapeDtypeStruct((rows, cols), dtype),
        grid_spec=pltpu.PrefetchScalarGridSpec(
            num_scalar_prefetch=0,
            grid=grid,
            in_specs=[pl.BlockSpec((tile_rows, cols), lambda i: (i, 0))],
            out_specs=pl.BlockSpec((tile_rows, cols), lambda i: (i, 0)),
        ),
        compiler_params=pltpu.CompilerParams(
            dimension_semantics=("parallel",),
            vmem_limit_bytes=vmem_limit,
            # In the rare non-divisible case, fuse the tiny pad into the
            # pallas_call operand instead of materializing an extra HBM pass.
            allow_input_fusion=[True] if needs_pad else None,
        ),
        cost_estimate=cost,
    )(x2d)

    out_flat = out2d.reshape(-1)
    if needs_pad:
        out_flat = out_flat[:total]
    return out_flat.reshape(orig_shape)


if __name__ == "__main__":
    key = jax.random.PRNGKey(0)
    # Small NCHW-like input consistent with the module usage.
    x = jax.random.normal(key, (2, 4, 16, 16), dtype=jnp.float32)

    y = jax.block_until_ready(log_compression(x))

    # Reference check (plain JAX).
    y_ref = jnp.log(jnp.abs(x) + 1.0)
    assert y.shape == x.shape and y.dtype == x.dtype
    assert jnp.allclose(y, y_ref, atol=1e-5, rtol=1e-5)

    print("KERNEL_OK")
</pallas_src>

<mosaic_0001>
module attributes {stable_mosaic.version = 11 : i64} {
  func.func @_log_compression_kernel(%arg0: i32, %arg1: memref<1x2048xf32, #tpu.memory_space<vmem>>, %arg2: memref<1x2048xf32, #tpu.memory_space<vmem>>) attributes {dimension_semantics = [#tpu.dimension_semantics<parallel>], iteration_bounds = array<i64: 1>, scalar_prefetch = 0 : i64, scratch_operands = 0 : i64, tpu.core_type = #tpu.core_type<tc>, window_params = [{transform_indices = @transform_0, window_bounds = array<i64: 1, 2048>}, {transform_indices = @transform_1, window_bounds = array<i64: 1, 2048>}]} {
    %c0 = arith.constant 0 : index
    %c0_0 = arith.constant 0 : index
    %0 = vector.load %arg1[%c0, %c0_0] : memref<1x2048xf32, #tpu.memory_space<vmem>>, vector<1x2048xf32>
    %1 = math.absf %0 : vector<1x2048xf32>
    %2 = math.log1p %1 : vector<1x2048xf32>
    %c0_1 = arith.constant 0 : index
    %c0_2 = arith.constant 0 : index
    %3 = vector.load %arg2[%c0_1, %c0_2] : memref<1x2048xf32, #tpu.memory_space<vmem>>, vector<1x2048xf32>
    tpu.vector_store %arg2[%c0_1, %c0_2], %2 {strides = array<i32>} : memref<1x2048xf32, #tpu.memory_space<vmem>>, vector<1x2048xf32>,
    return
  }
  func.func @transform_0(%arg0: i32) -> (i32, i32) {
    %c0_i32 = arith.constant 0 : i32
    %c0_i32_0 = arith.constant 0 : i32
    return %arg0, %c0_i32 : i32, i32
  }
  func.func @transform_1(%arg0: i32) -> (i32, i32) {
    %c0_i32 = arith.constant 0 : i32
    %c0_i32_0 = arith.constant 0 : i32
    return %arg0, %c0_i32 : i32, i32
  }
}

</mosaic_0001>

<bundles_post_ra>
// kernel: tpu_custom_call.1
= control target key start
LH: loop header
LB: loop body
LE: loop exit
PB: predicated region body
PF: predicated region fallthrough
CT: control target
= control target key end

     0   :  { %6 = vsyncpa [#allocation3], 0  ;;  %s140_s0 = inlined_call_operand.hbm [shape: f32[1,2048], index: 0, kind: input, shape index: {}]   ;;  %s141_s1 = inlined_call_operand.hbm [shape: f32[1,2048], index: 1, kind: output, shape index: {}]  }
   0x1   :  { %7 = vsyncpa [#allocation4], 0  ;;  %s13_s8 = sshll.u32 %s140_s0, 4  ;;  %s122_s9 = smov [#allocation2]   ;;  %s14_s8 = int_to_ptr.hbm [resolvable:$true] %s13_s8 }
   0x2   :  { %s15_s10 = sshll.u32 %s122_s9, 4  ;;  %s16_s10 = int_to_ptr.vmem [resolvable:$true] %s15_s10 }
   0x3   :  { %18 = dma.hbm_to_vmem [thread:$0]  %s14_s8, 256, %s16_s10, [#allocation3]  }
   0x4   :  { %118 = dma.done.wait [#allocation3], 256  }
   0x5   :  { %119 = vsyncadd [#allocation3], 4294967040  ;;  %v23_v0 = vld [vmem:[#allocation2] sm:$0xff]  ;;  %v24_v1 = vld [vmem:[#allocation2 + $0x8] sm:$0xff]  ;;  %s123_s0 = smov [#allocation5]   ;;  %s54_s14 = sshll.u32 %s141_s1, 4  ;;  %s55_s14 = int_to_ptr.hbm [resolvable:$true] %s54_s14 }
   0x6   :  { %v25_v2 = vand.u32 2147483647, %v23_v0  ;;  %v26_v3 = vand.u32 2147483647, %v24_v1  ;;  %s52_s11 = sshll.u32 %s123_s0, 4  ;;  %s53_s11 = int_to_ptr.vmem [resolvable:$true] %s52_s11 }
   0x8   :  { %v27_v4 = vadd.f32 1.0, %v25_v2  ;;  %v30_v5 = vmul.f32 -0.5, %v25_v2  ;;  %v36_v6 = vadd.f32 1.0, %v26_v3  ;;  %v39_v7 = vmul.f32 -0.5, %v26_v3 }
   0x9   :  { %vm34_vm0 = vcmp.lt.f32.partialorder %v25_v2, 0.0004427343  ;;  %vm43_vm1 = vcmp.lt.f32.partialorder %v26_v3, 0.0004427343 }
   0xa   :  { %66 = vlog2.f32 %v27_v4  ;;  %v31_v8 = vadd.f32 1.0, %v30_v5  ;;  %v40_v9 = vadd.f32 1.0, %v39_v7 }
   0xb   :  { %68 = vlog2.f32 %v36_v6 }
   0xc   :  { %v32_v10 = vmul.f32 %v31_v8, %v25_v2  ;;  %v41_v12 = vmul.f32 %v40_v9, %v26_v3 }
  0x10   :  { %v67_v11 = vpop.eup %66 }
  0x11   :  { %v69_v13 = vpop.eup %68  ;;  %v29_v14 = vmul.f32 0.6931472, %v67_v11 }
  0x12   :  { %v38_v15 = vmul.f32 0.6931472, %v69_v13 }
  0x13   :  { %v35_v16 = vsel %vm34_vm0, %v32_v10, %v29_v14 }
  0x14   :  { %45 = vst [vmem:[#allocation5] sm:$0xff] %v35_v16  ;;  %v44_v17 = vsel %vm43_vm1, %v41_v12, %v38_v15 }
  0x15   :  { %46 = vst [vmem:[#allocation5 + $0x8] sm:$0xff] %v44_v17 }
  0x16   :  { %57 = dma.vmem_to_hbm [thread:$0]  %s53_s11, 256, %s55_s14, [#allocation4]  }
  0x17   :  { %120 = dma.done.wait [#allocation4], 256  }
  0x18   :  { %121 = vsyncadd [#allocation4], 4294967040 }
  0x19   :  { %62 = vsyncpa [#allocation3], 1 }
  0x1a   :  { %63 = vsyncpa [#allocation4], 1 }

</bundles_post_ra>
